<compile_context>
chip_gen: v6e
topology: v6e:2x2x1
jax: 0.10.0
libtpu: 0.0.40
codegen_flags: <defaults>
</compile_context>

<pallas_src>
import functools

import jax
import jax.numpy as jnp
from jax.experimental import pallas as pl
from jax.experimental.pallas import tpu as pltpu


def conv_block_kernel(x_ref, w_ref, b_ref, g_ref, beta_ref, o_ref, *, eps, inv_count):
    """One grid step = one block of output channels, full spatial extent.

    x_ref    : (2, Cin*K, N*L//2) bf16 — im2col'd input; plane 0 = even output
               positions, plane 1 = odd output positions.
    w_ref    : (tile_co, Cin*K)   bf16 — conv weights, columns ordered (k, c).
    b_ref    : (tile_co, 1)       f32  — conv bias.
    g_ref    : (tile_co, 1)       f32  — BN gamma.
    beta_ref : (tile_co, 1)       f32  — BN beta.
    o_ref    : (tile_co, N*L//2)  f32  — pooled output.
    """
    w = w_ref[...]                                                    # (tco, CK) bf16

    # --- circular Conv1d: one MXU matmul per parity plane, f32 accumulation ---
    z0 = jnp.dot(w, x_ref[0], preferred_element_type=jnp.float32)    # (tco, M) f32
    z1 = jnp.dot(w, x_ref[1], preferred_element_type=jnp.float32)    # (tco, M) f32

    # --- BatchNorm1d (training mode): one-pass per-channel batch stats in f32 ---
    s = jnp.sum(z0, axis=1, keepdims=True) + jnp.sum(z1, axis=1, keepdims=True)
    ss = jnp.sum(z0 * z0, axis=1, keepdims=True) + jnp.sum(z1 * z1, axis=1, keepdims=True)
    mean_z = s * inv_count                                  # mean of conv output (sans bias)
    var = jnp.maximum(ss * inv_count - mean_z * mean_z, 0.0)  # biased var; bias-invariant

    b = b_ref[...]
    gamma = g_ref[...]
    beta = beta_ref[...]
    mean = mean_z + b                                       # true batch mean of conv output
    scale = gamma * jax.lax.rsqrt(var + eps)                # rsqrt -> EUP (free slot)
    shift = (b - mean) * scale + beta                       # fold conv bias + BN mean/affine

    # --- ReLU, then AvgPool1d(2) as a VPU pairwise average of even/odd planes ---
    r0 = jnp.maximum(z0 * scale + shift, 0.0)
    r1 = jnp.maximum(z1 * scale + shift, 0.0)
    o_ref[...] = (0.5 * (r0 + r1)).astype(o_ref.dtype)


def conv_block(x, w, b, gamma, beta, *, padding, eps=1e-3, tile_co=None):
    """x: (N, Cin, L) f32; w: (Cout, Cin, K); b/gamma/beta: (Cout,). Returns (N, Cout, L//2)."""
    N, Cin, L = x.shape
    Cout, _, K = w.shape
    assert K == 2 * padding + 1, "expects 'same' circular conv (K = 2*padding + 1)"
    assert L % 2 == 0, "AvgPool1d(2) path expects even length"
    Lh = L // 2
    M = N * Lh
    CK = Cin * K

    if tile_co is None:
        tile_co = Cout
        for cand in (256, 128, 64, 32, 16, 8):
            if Cout % cand == 0:
                tile_co = cand
                break
    assert Cout % tile_co == 0 and (tile_co % 8 == 0 or tile_co == Cout), (Cout, tile_co)

    # --- im2col with circular padding (layout plumbing, done once in XLA) ---
    # taps[k][n, c, l] = x[n, c, (l + k - padding) mod L]
    taps = [jnp.roll(x, padding - k, axis=2) for k in range(K)]
    xc = jnp.stack(taps, axis=0)                  # (K, N, Cin, L)
    xc = xc.transpose(0, 2, 1, 3)                 # (K, Cin, N, L)
    xc = xc.reshape(K, Cin, N, Lh, 2)             # split L -> (Lh, even/odd)
    xc = xc.transpose(4, 0, 1, 2, 3)              # (2, K, Cin, N, Lh)
    xc = xc.reshape(2, CK, M).astype(jnp.bfloat16)

    # weights: column index = k*Cin + c (matches xc row ordering)
    w2 = jnp.transpose(w, (0, 2, 1)).reshape(Cout, CK).astype(jnp.bfloat16)

    b2 = b.reshape(Cout, 1).astype(jnp.float32)
    g2 = gamma.reshape(Cout, 1).astype(jnp.float32)
    beta2 = beta.reshape(Cout, 1).astype(jnp.float32)

    # --- VMEM budget: double-buffered inputs/output + f32 temporaries + headroom ---
    bytes_in = 2 * CK * M * 2 + tile_co * CK * 2 + 3 * tile_co * 4
    bytes_out = tile_co * M * 4
    bytes_tmp = 6 * tile_co * M * 4
    vmem_limit = int(min(2 * (bytes_in + bytes_out) + bytes_tmp + (4 << 20),
                         100 * 1024 * 1024))

    kern = functools.partial(conv_block_kernel, eps=eps, inv_count=1.0 / (N * L))
    out2 = pl.pallas_call(
        kern,
        out_shape=jax.ShapeDtypeStruct((Cout, M), jnp.float32),
        grid_spec=pltpu.PrefetchScalarGridSpec(
            num_scalar_prefetch=0,
            grid=(Cout // tile_co,),
            in_specs=[
                pl.BlockSpec((2, CK, M), lambda i: (0, 0, 0)),    # im2col'd x (stays resident)
                pl.BlockSpec((tile_co, CK), lambda i: (i, 0)),    # weights
                pl.BlockSpec((tile_co, 1), lambda i: (i, 0)),     # conv bias
                pl.BlockSpec((tile_co, 1), lambda i: (i, 0)),     # gamma
                pl.BlockSpec((tile_co, 1), lambda i: (i, 0)),     # beta
            ],
            out_specs=pl.BlockSpec((tile_co, M), lambda i: (i, 0)),
        ),
        compiler_params=pltpu.CompilerParams(
            dimension_semantics=("parallel",),
            vmem_limit_bytes=vmem_limit),
    )(xc, w2, b2, g2, beta2)

    # (Cout, N*Lh) -> (N, Cout, Lh)
    return out2.reshape(Cout, N, Lh).transpose(1, 0, 2)


def ref_forward(x, w, b, gamma, beta, padding, eps=1e-3):
    """Pure-JAX reference mirroring the PyTorch module (training-mode BN)."""
    xp = jnp.concatenate([x[..., -padding:], x, x[..., :padding]], axis=-1)  # circular pad
    y = jax.lax.conv_general_dilated(
        xp, w, window_strides=(1,), padding='VALID',
        dimension_numbers=('NCH', 'OIH', 'NCH'))
    y = y + b[None, :, None]
    mean = y.mean(axis=(0, 2), keepdims=True)
    var = ((y - mean) ** 2).mean(axis=(0, 2), keepdims=True)
    y = gamma[None, :, None] * (y - mean) / jnp.sqrt(var + eps) + beta[None, :, None]
    y = jnp.maximum(y, 0.0)
    N, C, L = y.shape
    return y.reshape(N, C, L // 2, 2).mean(-1)


if __name__ == "__main__":
    # Module config: Conv_block(in_channels=4, out_channels=16, kernel_size=3, padding=1)
    N, Cin, Cout, L, K, P = 2, 4, 16, 128, 3, 1
    eps = 1e-3

    key = jax.random.PRNGKey(0)
    kx, kw, kb = jax.random.split(key, 3)
    x = jax.random.normal(kx, (N, Cin, L), dtype=jnp.float32)
    bound = 1.0 / (Cin * K) ** 0.5
    w = jax.random.uniform(kw, (Cout, Cin, K), jnp.float32, -bound, bound)
    b = jax.random.uniform(kb, (Cout,), jnp.float32, -bound, bound)
    gamma = jnp.ones((Cout,), jnp.float32)        # nn.BatchNorm1d default affine params
    beta = jnp.zeros((Cout,), jnp.float32)

    out = conv_block(x, w, b, gamma, beta, padding=P, eps=eps, tile_co=8)  # 2-step grid
    out = jax.block_until_ready(out)
    assert out.shape == (N, Cout, L // 2), out.shape

    # Tight check: reference fed bf16-rounded conv inputs (kernel uses a bf16 MXU matmul
    # with f32 accumulation; BN/ReLU/pool are f32), isolating summation-order noise only.
    xr = x.astype(jnp.bfloat16).astype(jnp.float32)
    wr = w.astype(jnp.bfloat16).astype(jnp.float32)
    ref_bf16 = ref_forward(xr, wr, b, gamma, beta, P, eps)
    assert jnp.allclose(out, ref_bf16, rtol=1e-3, atol=1e-3), \
        float(jnp.abs(out - ref_bf16).max())

    # Loose sanity check against the full-f32 reference (covers bf16 input rounding).
    ref_f32 = ref_forward(x, w, b, gamma, beta, P, eps)
    assert jnp.allclose(out, ref_f32, rtol=5e-2, atol=5e-2), \
        float(jnp.abs(out - ref_f32).max())

    print("KERNEL_OK")
</pallas_src>

<mosaic_0001>
module attributes {stable_mosaic.version = 11 : i64} {
  func.func @conv_block_kernel(%arg0: i32, %arg1: memref<2x12x128xbf16, #tpu.memory_space<vmem>>, %arg2: memref<8x12xbf16, #tpu.memory_space<vmem>>, %arg3: memref<8x1xf32, #tpu.memory_space<vmem>>, %arg4: memref<8x1xf32, #tpu.memory_space<vmem>>, %arg5: memref<8x1xf32, #tpu.memory_space<vmem>>, %arg6: memref<8x128xf32, #tpu.memory_space<vmem>>) attributes {dimension_semantics = [#tpu.dimension_semantics<parallel>], iteration_bounds = array<i64: 2>, scalar_prefetch = 0 : i64, scratch_operands = 0 : i64, tpu.core_type = #tpu.core_type<tc>, window_params = [{pipeline_mode = #tpu.pipeline_mode<synchronous>, transform_indices = @transform_0, window_bounds = array<i64: 2, 12, 128>}, {transform_indices = @transform_1, window_bounds = array<i64: 8, 12>}, {transform_indices = @transform_2, window_bounds = array<i64: 8, 1>}, {transform_indices = @transform_3, window_bounds = array<i64: 8, 1>}, {transform_indices = @transform_4, window_bounds = array<i64: 8, 1>}, {transform_indices = @transform_5, window_bounds = array<i64: 8, 128>}]} {
    %c0 = arith.constant 0 : index
    %c0_0 = arith.constant 0 : index
    %0 = vector.load %arg2[%c0, %c0_0] : memref<8x12xbf16, #tpu.memory_space<vmem>>, vector<8x12xbf16>
    %c0_1 = arith.constant 0 : index
    %c0_2 = arith.constant 0 : index
    %c0_3 = arith.constant 0 : index
    %1 = vector.load %arg1[%c0_1, %c0_2, %c0_3] : memref<2x12x128xbf16, #tpu.memory_space<vmem>>, vector<1x12x128xbf16>
    %2 = vector.shape_cast %1 : vector<1x12x128xbf16> to vector<12x128xbf16>
    %cst = arith.constant dense<0.000000e+00> : vector<8x128xf32>
    %3 = tpu.matmul %0, %2, %cst {dimension_numbers = #tpu.dot_dimension_numbers<[1], [0], [0], [1], [0, 0, 1, 1], [], []>} : vector<8x12xbf16>, vector<12x128xbf16>, vector<8x128xf32> -> vector<8x128xf32>
    %c1 = arith.constant 1 : index
    %c0_4 = arith.constant 0 : index
    %c0_5 = arith.constant 0 : index
    %4 = vector.load %arg1[%c1, %c0_4, %c0_5] : memref<2x12x128xbf16, #tpu.memory_space<vmem>>, vector<1x12x128xbf16>
    %5 = vector.shape_cast %4 : vector<1x12x128xbf16> to vector<12x128xbf16>
    %cst_6 = arith.constant dense<0.000000e+00> : vector<8x128xf32>
    %6 = tpu.matmul %0, %5, %cst_6 {dimension_numbers = #tpu.dot_dimension_numbers<[1], [0], [0], [1], [0, 0, 1, 1], [], []>} : vector<8x12xbf16>, vector<12x128xbf16>, vector<8x128xf32> -> vector<8x128xf32>
    %cst_7 = arith.constant dense<0.000000e+00> : vector<8xf32>
    %7 = vector.multi_reduction <add>, %3, %cst_7 [1] : vector<8x128xf32> to vector<8xf32>
    %8 = vector.shape_cast %7 : vector<8xf32> to vector<8x1xf32>
    %cst_8 = arith.constant dense<0.000000e+00> : vector<8xf32>
    %9 = vector.multi_reduction <add>, %6, %cst_8 [1] : vector<8x128xf32> to vector<8xf32>
    %10 = vector.shape_cast %9 : vector<8xf32> to vector<8x1xf32>
    %11 = arith.addf %8, %10 : vector<8x1xf32>
    %12 = arith.mulf %3, %3 : vector<8x128xf32>
    %cst_9 = arith.constant dense<0.000000e+00> : vector<8xf32>
    %13 = vector.multi_reduction <add>, %12, %cst_9 [1] : vector<8x128xf32> to vector<8xf32>
    %14 = vector.shape_cast %13 : vector<8xf32> to vector<8x1xf32>
    %15 = arith.mulf %6, %6 : vector<8x128xf32>
    %cst_10 = arith.constant dense<0.000000e+00> : vector<8xf32>
    %16 = vector.multi_reduction <add>, %15, %cst_10 [1] : vector<8x128xf32> to vector<8xf32>
    %17 = vector.shape_cast %16 : vector<8xf32> to vector<8x1xf32>
    %18 = arith.addf %14, %17 : vector<8x1xf32>
    %cst_11 = arith.constant 3.906250e-03 : f32
    %19 = vector.broadcast %cst_11 : f32 to vector<8x1xf32>
    %20 = arith.mulf %11, %19 : vector<8x1xf32>
    %cst_12 = arith.constant 3.906250e-03 : f32
    %21 = vector.broadcast %cst_12 : f32 to vector<8x1xf32>
    %22 = arith.mulf %18, %21 : vector<8x1xf32>
    %23 = arith.mulf %20, %20 : vector<8x1xf32>
    %24 = arith.subf %22, %23 : vector<8x1xf32>
    %cst_13 = arith.constant 0.000000e+00 : f32
    %25 = vector.broadcast %cst_13 : f32 to vector<8x1xf32>
    %26 = arith.maximumf %24, %25 : vector<8x1xf32>
    %c0_14 = arith.constant 0 : index
    %c0_15 = arith.constant 0 : index
    %27 = vector.load %arg3[%c0_14, %c0_15] : memref<8x1xf32, #tpu.memory_space<vmem>>, vector<8x1xf32>
    %c0_16 = arith.constant 0 : index
    %c0_17 = arith.constant 0 : index
    %28 = vector.load %arg4[%c0_16, %c0_17] : memref<8x1xf32, #tpu.memory_space<vmem>>, vector<8x1xf32>
    %c0_18 = arith.constant 0 : index
    %c0_19 = arith.constant 0 : index
    %29 = vector.load %arg5[%c0_18, %c0_19] : memref<8x1xf32, #tpu.memory_space<vmem>>, vector<8x1xf32>
    %30 = arith.addf %20, %27 : vector<8x1xf32>
    %cst_20 = arith.constant 1.000000e-03 : f32
    %31 = vector.broadcast %cst_20 : f32 to vector<8x1xf32>
    %32 = arith.addf %26, %31 : vector<8x1xf32>
    %33 = math.rsqrt %32 : vector<8x1xf32>
    %34 = arith.mulf %28, %33 : vector<8x1xf32>
    %35 = arith.subf %27, %30 : vector<8x1xf32>
    %36 = arith.mulf %35, %34 : vector<8x1xf32>
    %37 = arith.addf %36, %29 : vector<8x1xf32>
    %38 = vector.broadcast %34 : vector<8x1xf32> to vector<8x128xf32>
    %39 = arith.mulf %3, %38 : vector<8x128xf32>
    %40 = vector.broadcast %37 : vector<8x1xf32> to vector<8x128xf32>
    %41 = arith.addf %39, %40 : vector<8x128xf32>
    %cst_21 = arith.constant 0.000000e+00 : f32
    %42 = vector.broadcast %cst_21 : f32 to vector<8x128xf32>
    %43 = arith.maximumf %41, %42 : vector<8x128xf32>
    %44 = vector.broadcast %34 : vector<8x1xf32> to vector<8x128xf32>
    %45 = arith.mulf %6, %44 : vector<8x128xf32>
    %46 = vector.broadcast %37 : vector<8x1xf32> to vector<8x128xf32>
    %47 = arith.addf %45, %46 : vector<8x128xf32>
    %cst_22 = arith.constant 0.000000e+00 : f32
    %48 = vector.broadcast %cst_22 : f32 to vector<8x128xf32>
    %49 = arith.maximumf %47, %48 : vector<8x128xf32>
    %50 = arith.addf %43, %49 : vector<8x128xf32>
    %cst_23 = arith.constant 5.000000e-01 : f32
    %51 = vector.broadcast %cst_23 : f32 to vector<8x128xf32>
    %52 = arith.mulf %51, %50 : vector<8x128xf32>
    %c0_24 = arith.constant 0 : index
    %c0_25 = arith.constant 0 : index
    %53 = vector.load %arg6[%c0_24, %c0_25] : memref<8x128xf32, #tpu.memory_space<vmem>>, vector<8x128xf32>
    tpu.vector_store %arg6[%c0_24, %c0_25], %52 {strides = array<i32>} : memref<8x128xf32, #tpu.memory_space<vmem>>, vector<8x128xf32>,
    return
  }
  func.func @transform_0(%arg0: i32) -> (i32, i32, i32) {
    %c0_i32 = arith.constant 0 : i32
    %c0_i32_0 = arith.constant 0 : i32
    %c0_i32_1 = arith.constant 0 : i32
    %c0_i32_2 = arith.constant 0 : i32
    return %c0_i32, %c0_i32_0, %c0_i32_1 : i32, i32, i32
  }
  func.func @transform_1(%arg0: i32) -> (i32, i32) {
    %c0_i32 = arith.constant 0 : i32
    %c0_i32_0 = arith.constant 0 : i32
    return %arg0, %c0_i32 : i32, i32
  }
  func.func @transform_2(%arg0: i32) -> (i32, i32) {
    %c0_i32 = arith.constant 0 : i32
    %c0_i32_0 = arith.constant 0 : i32
    return %arg0, %c0_i32 : i32, i32
  }
  func.func @transform_3(%arg0: i32) -> (i32, i32) {
    %c0_i32 = arith.constant 0 : i32
    %c0_i32_0 = arith.constant 0 : i32
    return %arg0, %c0_i32 : i32, i32
  }
  func.func @transform_4(%arg0: i32) -> (i32, i32) {
    %c0_i32 = arith.constant 0 : i32
    %c0_i32_0 = arith.constant 0 : i32
    return %arg0, %c0_i32 : i32, i32
  }
  func.func @transform_5(%arg0: i32) -> (i32, i32) {
    %c0_i32 = arith.constant 0 : i32
    %c0_i32_0 = arith.constant 0 : i32
    return %arg0, %c0_i32 : i32, i32
  }
}

</mosaic_0001>

<bundles_post_ra>
// kernel: tpu_custom_call.1
= control target key start
LH: loop header
LB: loop body
LE: loop exit
PB: predicated region body
PF: predicated region fallthrough
CT: control target
= control target key end

     0   :  { %10 = vsyncpa [#allocation3], 0  ;;  %s819_s0 = inlined_call_operand.vmem [shape: bf16[2,12,128], index: 0, kind: input, shape index: {}]   ;;  %s820_s1 = inlined_call_operand.vmem [shape: bf16[16,12], index: 1, kind: input, shape index: {}]   ;;  %s821_s2 = inlined_call_operand.vmem [shape: f32[16,1], index: 2, kind: input, shape index: {}]   ;;  %s822_s3 = inlined_call_operand.vmem [shape: f32[16,1], index: 3, kind: input, shape index: {}]   ;;  %s823_s4 = inlined_call_operand.vmem [shape: f32[16,1], index: 4, kind: input, shape index: {}]   ;;  %s824_s5 = inlined_call_operand.hbm [shape: f32[16,128], index: 5, kind: output, shape index: {}]  }
   0x1   :  { %12 = vsyncpa [#allocation3 + $0x1], 0  ;;  %s713_s18 = smov 0   ;;  %s715_s19 = smov 0  }
   0x2   :  { %s717_s20 = smov 0   ;;  %s719_s21 = smov 0  }
   0x3 LB: > { %s734_s22 = sadd.s32 4294967295, %s677_s21   ;;  %s534_s23 = sadd.s32 4294967294, %s677_s21   ;;  %s677_s21 = sphi %s719_s21, %s830_s21   ;;  %s673_s20 = sphi %s717_s20, %s829_s20   ;;  %s669_s19 = sphi %s715_s19, %s828_s19   ;;  %s665_s18 = sphi %s713_s18, %s827_s18  }
   0x4   : > { %s738_s24 = sadd.s32 1, %s677_s21   ;;  %s150_s25 = sadd.s32 1, %s673_s20 }
   0x5   : > { %s147_s26 = ssub.s32 %s677_s21, %s738_s24  ;;  %p160_p0 = scmp.ne.s32.totalorder %s673_s20, %s669_s19 }
   0x6   : > { %p148_p1 = scmp.eq.s32.totalorder %s147_s26, 0  ;;  %p161_p2 = scmp.eq.s32.totalorder %s734_s22, 1 }
   0x7   : > { %p166_p3 = scmp.ne.s32.totalorder %s669_s19, %s665_s18  ;;  %p167_p4 = scmp.eq.s32.totalorder %s534_s23, 1 }
   0x8   : > { %s749_s27 = scalar_select %p148_p1, %s673_s20, %s150_s25  }
   0x9   : > { %p751_p5 = por %p161_p2, %p160_p0  ;;  %p755_p6 = por %p167_p4, %p166_p3 }
   0xa   : > { %p537_p7 = scmp.ge.s32.totalorder %s677_s21, 1  ;;  %p216_p8 = scmp.lt.s32.totalorder %s677_s21, 3 }
   0xc   : > { %p217_p9 = pnand %p537_p7, %p216_p8 }
   0xd   : > { %p255_p10 = scmp.lt.s32.totalorder (!%p217_p9), %s734_s22, 1  ;;  %s252_s8 = sand.u32 (!%p217_p9), 1, %s669_s19  }
   0xe   : > { %220 = sbr.rel (%p217_p9) target bundleno = 537 (0x219), region = 40  ;;  %s426_s16 = scalar_lea.sflag (!%p217_p9), [#allocation3], %s252_s8 }
   0xf   : > { %s682_s23 = smov (!%p217_p9), [#allocation2]  }
  0x10   : > { %s621_s25 = sshll.u32 (!%p217_p9), %s682_s23, 4  ;;  %s622_s25 = int_to_ptr.vmem [resolvable:$false] %s621_s25 }
  0x13   : > { %vm284_vm0 = vcmask 1045504   ;;  %v679_v0 = vmov 0.0   ;;  %v613_v1 = vld [vmem:[%s819_s0] sm:$0x3f]   ;;  %v614_v2 = vld [vmem:[%s819_s0 + $0x8] sm:$0x3f]  }
  0x14   : > { %557 = vmatprep.subr.bf16.mxu0 %v679_v0  ;;  %563 = vmatprep.subr.bf16.mxu1 %v679_v0  ;;  %v286_v3 = vsel %vm284_vm0, %v613_v1, 0  ;;  %vm680_vm1 = vmmov 0   ;;  %v337_v4 = vsel %vm284_vm0, %v614_v2, 0  ;;  %s769_s9 = scalar_select %p255_p10, %s734_s22, 1  ;;  %vm280_vm2 = vcmask 97280  }
  0x15   : > { %559 = vmatprep.mubr.msk.bf16.mxu0 %vm680_vm1, %v679_v0  ;;  %565 = vmatprep.mubr.msk.bf16.mxu1 %vm680_vm1, %v679_v0  ;;  %v681_v16 = vmov 0  }
  0x16   : > { %558 = vmatpush3.bf16.msra.mxu0 %v286_v3  ;;  %564 = vmatpush3.bf16.msra.mxu1 %v337_v4  ;;  %s539_s10 = sshll.u32 %s769_s9, 2  ;;  %s540_s14 = sshll.u32 %s769_s9, 3 }
  0x17   : > { %s258_s13 = scalar_lea.vmem %s820_s1, %s539_s10  ;;  %611 = vset.pattern.permute.xlu0 %v681_v16  ;;  %612 = vset.pattern.permute.xlu1 %v681_v16  ;;  %s262_s17 = scalar_lea.vmem %s821_s2, %s540_s14 }
  0x18   : > { %v272_v5 = vld [vmem:[%s258_s13] sm:$0xf]  ;;  %s266_s26 = scalar_lea.vmem %s822_s3, %s540_s14  ;;  %s270_s7 = scalar_lea.vmem %s823_s4, %s540_s14 }
  0x19   : > { %560 = vmatmul.mubr.msk.bf16.vlgmr.msra.gmra.mxu0 %vm280_vm2, %v272_v5  ;;  %566 = vmatmul.mubr.msk.bf16.vlgmr.msra.gmra.mxu1 %vm280_vm2, %v272_v5  ;;  %v396_v29 = vld [vmem:[%s262_s17] sm:$0xff]  ;;  %s538_s9 = sshll.u32 %s252_s8, 3  ;;  %s550_s10 = sshll.u32 %s734_s22, 7 }
  0x1a   : > { %v397_v31 = vld [vmem:[%s266_s26] sm:$0xff]  ;;  %s254_s11 = scalar_lea.vmem [#allocation2], %s538_s9  ;;  %s437_s15 = scalar_lea.hbm %s824_s5, %s550_s10 }
  0x1b   : > { %v398_v35 = vld [vmem:[%s270_s7] sm:$0xff]  ;;  %s439_s12 = sshll.u32 %s254_s11, 4  ;;  %s623_s22 = scalar_lea.vmem %s622_s25, 256  ;;  %s440_s12 = int_to_ptr.vmem [resolvable:$true] %s439_s12 }
  0x1c   : > { %s617_s17 = scalar_lea.vmem %s440_s12, 128  ;;  %p624_p0 = scmp.lt.s32.totalorder %s440_s12, %s622_s25 }
  0x1d   : > { %p618_p11 = scmp.ne.s32.totalorder %s440_s12, %s617_s17  ;;  %p625_p1 = scmp.lt.s32.totalorder %s623_s22, %s617_s17 }
  0x1f   : > { %p619_p12 = pnand %p618_p11, %p751_p5  ;;  %p626_p2 = por %p625_p1, %p624_p0 }
  0x21   : > { %p620_p13 = pneg %p619_p12 }
  0x23   : > { %p627_p3 = pnand %p626_p2, %p620_p13 }
  0xd9   : > { %v322_v6 = vpop.f32.mrf.mxu0  ;;  %v373_v7 = vpop.f32.mrf.mxu1 }
  0xda   : > { %379 = vadd.xlane.f32.xlu0 %v322_v6  ;;  %v384_v8 = vmul.f32 %v322_v6, %v322_v6  ;;  %v387_v11 = vmul.f32 %v373_v7, %v373_v7 }
  0xdb   : > { %v561_v9 = vpop.f32.mrf.mxu0  ;;  %v567_v10 = vpop.f32.mrf.mxu1 }
  0xdc   : > { %385 = vadd.xlane.f32.xlu1 %v384_v8 }
  0xdd   : > { %v325_v12 = vpop.f32.mrf.mxu0  ;;  %v376_v13 = vpop.f32.mrf.mxu1 }
  0xde   : > { %381 = vadd.xlane.f32.xlu0 %v373_v7 }
  0xdf   : > { %v562_v14 = vpop.f32.mrf.mxu0  ;;  %v568_v15 = vpop.f32.mrf.mxu1 }
  0xe0   : > { %388 = vadd.xlane.f32.xlu1 %v387_v11 }
 0x163   : > { %v380_v17 = vpop.xlane.xlu0 %379 }
 0x165   : > { %v386_v18 = vpop.xlane.xlu1 %385 }
 0x167   : > { %v382_v19 = vpop.xlane.xlu0 %381 }
 0x168   : > { %v383_v20 = vadd.f32 %v382_v19, %v380_v17 }
 0x169   : > { %v389_v21 = vpop.xlane.xlu1 %388 }
 0x16a   : > { %v391_v22 = vmul.f32 0.00390625, %v383_v20  ;;  %v390_v23 = vadd.f32 %v389_v21, %v386_v18 }
 0x16c   : > { %v393_v24 = vmul.f32 %v391_v22, %v391_v22  ;;  %v392_v25 = vmul.f32 0.00390625, %v390_v23  ;;  %v399_v30 = vadd.f32 %v396_v29, %v391_v22 }
 0x16e   : > { %v394_v26 = vsub.f32 %v392_v25, %v393_v24  ;;  %v403_v33 = vsub.f32 %v396_v29, %v399_v30 }
 0x170   : > { %v395_v27 = vmax.f32 %v394_v26, 0.0 }
 0x172   : > { %v400_v28 = vadd.f32 0.001, %v395_v27 }
 0x174   : > { %615 = vrsqrt.f32 %v400_v28 }
 0x181   : > { %v616_v32 = vpop.eup %615 }
 0x182   : > { %v402_v34 = vmul.f32 %v616_v32, %v397_v31 }
 0x184   : > { %408 = vperm.xlu0 %611, %v402_v34   ;;  %v404_v36 = vmul.f32 %v403_v33, %v402_v34 }
 0x186   : > { %v405_v37 = vadd.f32 %v404_v36, %v398_v35 }
 0x188   : > { %414 = vperm.xlu1 %612, %v405_v37  }
 0x1ff   : > { %v409_v38 = vpop.permute.xlu0 %408 }
 0x200   : > { %v411_v39 = vmul.f32 %v409_v38, %v322_v6  ;;  %v419_v40 = vmul.f32 %v409_v38, %v373_v7 }
 0x203   : > { %v415_v41 = vpop.permute.xlu1 %414 }
 0x204   : > { %v417_v42 = vadd.f32 %v415_v41, %v411_v39  ;;  %v420_v43 = vadd.f32 %v419_v40, %v415_v41 }
 0x206   : > { %v418_v44 = vmax.f32 %v417_v42, 0.0  ;;  %v421_v45 = vmax.f32 %v420_v43, 0.0 }
 0x208   : > { %v422_v46 = vadd.f32 %v421_v45, %v418_v44 }
 0x20a   : > { %v423_v47 = vmul.f32 0.5, %v422_v46 }
 0x20c   : > { %424 = vst [vmem:[%s254_s11] sm:$0xff] %v423_v47 }
 0x20d   : > { %630 = shalt.err (!%p627_p3)
}
 0x20e   : > { %s631_s26 = scalar_lea.hbm %s437_s15, 128  ;;  %s635_s7 = scalar_lea.hbm %s824_s5, 256 }
 0x20f   : > { %p632_p4 = scmp.ne.s32.totalorder %s437_s15, %s631_s26  ;;  %p636_p9 = scmp.lt.s32.totalorder %s437_s15, %s824_s5 }
 0x210   : > { %p637_p10 = scmp.lt.s32.totalorder %s635_s7, %s631_s26 }
 0x211   : > { %p633_p7 = pnand %p632_p4, %p751_p5 }
 0x212   : > { %p638_p11 = por %p637_p10, %p636_p9 }
 0x213   : > { %p634_p8 = pneg %p633_p7 }
 0x215   : > { %p639_p12 = pnand %p638_p11, %p634_p8 }
 0x217   : > { %642 = shalt.err (!%p639_p12)
}
 0x218   : > { %569 = dma.vmem_to_hbm [thread:$0]  (%p751_p5), %s440_s12, 128, %s437_s15, %s426_s16  }
 0x219 PF: > { %p575_p13 = scmp.ge.s32.totalorder %s677_s21, 2  ;;  %s451_s10 = sand.u32 1, %s665_s18  }
 0x21a   : > { %s452_s11 = scalar_lea.sflag [#allocation3], %s451_s10 }
 0x21b   : > { %p572_p0 = pnand %p575_p13, %p755_p6 }
 0x21d   : > { %p573_p1 = pneg %p572_p0 }
 0x21f   : > { %660 = dma.done.wait (%p573_p1), %s452_s11, 128  }
 0x220   : > { %662 = vsyncadd (%p573_p1), %s452_s11, 4294967168  ;;  %p15_p2 = scmp.ge.s32.totalorder %s738_s24, 4   ;;  %s827_s18 = smov %s669_s19 }
 0x221   : > { %s828_s19 = smov %s673_s20  ;;  %s829_s20 = smov %s749_s27 }
 0x222   : > { %s830_s21 = smov %s738_s24  ;;  %17 = sbr.rel (!%p15_p2) target bundleno = 3 (0x3), region = 85 }
 0x227   :  { %457 = vsyncpa [#allocation3], 1 }
 0x228   :  { %459 = vsyncpa [#allocation3 + $0x1], 1 }

</bundles_post_ra>
